<compile_context>
chip_gen: v5e
topology: v5e:2x2
jax: 0.10.0
libtpu: 0.0.40
codegen_flags: <defaults>
</compile_context>

<pallas_src>
import functools

import jax
import jax.numpy as jnp
from jax import lax
from jax.experimental import pallas as pl
from jax.experimental.pallas import tpu as pltpu


def _round_up(x, m):
    return (x + m - 1) // m * m


# ----------------------------- Pallas kernel -------------------------------

def _patch_embed_kernel(x_ref, w_ref, b_ref, o_ref):
    # x_ref: (tm, K)   bf16 patch rows (row tile of the im2col matrix)
    # w_ref: (K, Hp)   bf16 projection, hidden padded to Hp (grid-invariant)
    # b_ref: (1, Hp)   f32 bias (grid-invariant)
    # o_ref: (tm, Hp)  output tile (lane-dense store: Hp % 128 == 0)
    acc = jnp.dot(x_ref[...], w_ref[...], preferred_element_type=jnp.float32)
    o_ref[...] = (acc + b_ref[...]).astype(o_ref.dtype)


def _patch_embed_matmul(x2d, w_t, bias2d, *, tm, out_dtype, fast=True):
    M, K = x2d.shape
    _, Hp = w_t.shape
    assert tm % 8 == 0 and Hp % 128 == 0
    # Ragged last tile: Pallas masks the out-of-bounds rows of the final block,
    # so no padding of M (and no extra HBM copies) is needed.
    grid_m = pl.cdiv(M, tm)

    # VMEM budget (counting default double buffers, plus margin).  Never
    # request the whole physical per-TC VMEM (v7x has only 64 MiB): cap at
    # 48 MiB, floor at 32 MiB (v5e default scoped VMEM is only 16 MiB).
    need = (2 * tm * K * x2d.dtype.itemsize
            + 2 * K * Hp * w_t.dtype.itemsize
            + 2 * tm * Hp * jnp.dtype(out_dtype).itemsize
            + 2 * 8 * Hp * bias2d.dtype.itemsize)
    vmem_limit = int(min(max(need + (need >> 2), 32 << 20), 48 << 20))
    vmem_limit = max(vmem_limit, need + (2 << 20))   # never below actual demand

    # X: pipelined row tiles.  If profiling on v6e shows the X DMA still
    # exposed, bump to pipeline_mode=pl.Buffered(3).
    x_spec = pl.BlockSpec((tm, K), lambda i: (i, 0))
    if fast:
        # Weight/bias are constant blocks (index (0,0) every step, DMA'd once);
        # a single VMEM buffer suffices — saves K*Hp*2 bytes of VMEM.
        w_spec = pl.BlockSpec((K, Hp), lambda i: (0, 0),
                              pipeline_mode=pl.Buffered(1))
        b_spec = pl.BlockSpec((1, Hp), lambda i: (0, 0),
                              pipeline_mode=pl.Buffered(1))
        # Let XLA fuse the NCDHW -> (M, K) rearrange/cast producer into the
        # kernel's X operand instead of round-tripping it through HBM.
        allow_input_fusion = [True, False, False]
    else:
        w_spec = pl.BlockSpec((K, Hp), lambda i: (0, 0))
        b_spec = pl.BlockSpec((1, Hp), lambda i: (0, 0))
        allow_input_fusion = None

    return pl.pallas_call(
        _patch_embed_kernel,
        out_shape=jax.ShapeDtypeStruct((M, Hp), out_dtype),
        grid_spec=pltpu.PrefetchScalarGridSpec(
            num_scalar_prefetch=0,
            grid=(grid_m,),
            in_specs=[x_spec, w_spec, b_spec],
            out_specs=pl.BlockSpec((tm, Hp), lambda i: (i, 0)),
        ),
        compiler_params=pltpu.CompilerParams(
            # Row tiles are independent: "parallel" lets Mosaic shard this axis
            # across the two TensorCores on v7x (no-op on v5e/v6e).
            dimension_semantics=("parallel",),
            vmem_limit_bytes=vmem_limit,
            allow_input_fusion=allow_input_fusion,
        ),
    )(x2d, w_t, bias2d)


# ------------------------------- Wrapper ------------------------------------

def vjepa2_patch_embeddings_3d(pixel_values_videos, weight, bias,
                               *, tubelet_size, patch_size,
                               tm=1024, compute_dtype=jnp.bfloat16,
                               out_dtype=None, fast=True):
    """
    pixel_values_videos: (B, C, T, H, W)                        (NCDHW, like PyTorch)
    weight:              (hidden, C, tubelet, patch, patch)     (Conv3d OIDHW)
    bias:                (hidden,)
    returns:             (B, N, hidden) matching proj(x).flatten(2).transpose(1, 2)

    Note: operands are bf16 with f32 MXU accumulation and the output defaults
    to bf16 (halves HBM write traffic); pass out_dtype=jnp.float32 for an f32
    result at the cost of double the output bandwidth.
    """
    B, C, T, H, W = pixel_values_videos.shape
    hidden = weight.shape[0]
    if out_dtype is None:
        out_dtype = compute_dtype
    Tt, Ht, Wt = T // tubelet_size, H // patch_size, W // patch_size
    N = Tt * Ht * Wt
    M = B * N
    K = C * tubelet_size * patch_size * patch_size
    Hp = _round_up(hidden, 128)   # lane-dense output store (no masked vst)

    # Glue: NCDHW -> (B*N, K) patch rows (im2col of a stride==kernel Conv3d),
    # K flattened in (C, kT, kH, kW) order to match weight.reshape(hidden, -1).
    # Done in compute_dtype; with fast=True, allow_input_fusion lets XLA fuse
    # this producer into the pallas input path rather than a full HBM pass.
    # TODO(synk): a fully in-kernel rearrange (5D BlockSpec over the NCDHW
    # array + VMEM space-to-depth) would make that fusion unconditional.
    x = pixel_values_videos.astype(compute_dtype)
    x = x.reshape(B, C, Tt, tubelet_size, Ht, patch_size, Wt, patch_size)
    x = jnp.transpose(x, (0, 2, 4, 6, 1, 3, 5, 7))   # (B, T', H', W', C, kT, kH, kW)
    x2d = x.reshape(M, K)

    # Row tile: large by default (amortizes grid-step overhead on all chips),
    # shrunk adaptively for tiny inputs.  M is NOT padded: the cdiv grid plus
    # masked last-tile stores handle ragged M with zero extra HBM traffic.
    tm_eff = max(8, min(tm, _round_up(M, 8)))

    w_t = weight.reshape(hidden, K).astype(compute_dtype).T    # (K, hidden), bf16
    bias2d = bias.astype(jnp.float32).reshape(1, hidden)
    if Hp != hidden:   # only for non-multiple-of-128 hidden (not 1024/1408)
        w_t = jnp.pad(w_t, ((0, 0), (0, Hp - hidden)))
        bias2d = jnp.pad(bias2d, ((0, 0), (0, Hp - hidden)))

    out2d = _patch_embed_matmul(x2d, w_t, bias2d, tm=tm_eff,
                                out_dtype=out_dtype, fast=fast)
    if Hp != hidden:
        out2d = out2d[:, :hidden]
    return out2d.reshape(B, N, hidden)


# ------------------------------- Main / test ---------------------------------

if __name__ == "__main__":
    # Small config consistent with the module:
    in_chans = 4
    patch_size = 4
    tubelet_size = 2
    crop_size = 16          # H = W = 16
    frames_per_clip = 4     # T = 4
    hidden_size = 32
    batch = 2

    key = jax.random.PRNGKey(0)
    k_x, k_w, k_b = jax.random.split(key, 3)

    pixel_values_videos = jax.random.normal(
        k_x, (batch, in_chans, frames_per_clip, crop_size, crop_size), dtype=jnp.float32)
    # Conv3d weight shape: (out, in, kT, kH, kW)
    weight = 0.05 * jax.random.normal(
        k_w, (hidden_size, in_chans, tubelet_size, patch_size, patch_size), dtype=jnp.float32)
    bias = 0.1 * jax.random.normal(k_b, (hidden_size,), dtype=jnp.float32)

    def run(fast):
        fn = jax.jit(functools.partial(
            vjepa2_patch_embeddings_3d,
            tubelet_size=tubelet_size, patch_size=patch_size, fast=fast))
        return jax.block_until_ready(fn(pixel_values_videos, weight, bias))

    try:
        out = run(True)
    except Exception:
        # Graceful fallback for jax builds without pipeline_mode/Buffered or
        # input-fusion support: same kernel, default buffering, no fusion hint.
        out = run(False)

    # Reference: real strided 3D convolution (NCDHW / OIDHW) in f32, then
    # flatten + transpose.  The kernel uses bf16 operands / bf16 output with
    # f32 accumulation, so tolerances are loosened accordingly.
    conv = lax.conv_general_dilated(
        pixel_values_videos, weight,
        window_strides=(tubelet_size, patch_size, patch_size),
        padding="VALID",
        dimension_numbers=("NCDHW", "OIDHW", "NCDHW"),
    ) + bias.reshape(1, hidden_size, 1, 1, 1)
    Bd, Hd = conv.shape[0], conv.shape[1]
    ref = jnp.transpose(conv.reshape(Bd, Hd, -1), (0, 2, 1))

    assert out.shape == ref.shape, (out.shape, ref.shape)
    outf = out.astype(jnp.float32)
    err = jnp.abs(outf - ref)
    assert jnp.allclose(outf, ref, atol=5e-2, rtol=5e-2), float(jnp.max(err))
    assert float(jnp.mean(err)) < 1e-2, float(jnp.mean(err))

    print("KERNEL_OK")
</pallas_src>

<mosaic_0001>
module attributes {stable_mosaic.version = 11 : i64} {
  func.func @_patch_embed_kernel(%arg0: i32, %arg1: memref<64x128xbf16, #tpu.memory_space<vmem>>, %arg2: memref<128x128xbf16, #tpu.memory_space<vmem>>, %arg3: memref<1x128xf32, #tpu.memory_space<vmem>>, %arg4: memref<64x128xbf16, #tpu.memory_space<vmem>>) attributes {dimension_semantics = [#tpu.dimension_semantics<parallel>], iteration_bounds = array<i64: 1>, scalar_prefetch = 0 : i64, scratch_operands = 0 : i64, tpu.core_type = #tpu.core_type<tc>, window_params = [{transform_indices = @transform_0, window_bounds = array<i64: 64, 128>}, {pipeline_mode = #tpu.pipeline_mode<synchronous>, transform_indices = @transform_1, window_bounds = array<i64: 128, 128>}, {pipeline_mode = #tpu.pipeline_mode<synchronous>, transform_indices = @transform_2, window_bounds = array<i64: 1, 128>}, {transform_indices = @transform_3, window_bounds = array<i64: 64, 128>}]} {
    %c0 = arith.constant 0 : index
    %c0_0 = arith.constant 0 : index
    %0 = vector.load %arg1[%c0, %c0_0] : memref<64x128xbf16, #tpu.memory_space<vmem>>, vector<64x128xbf16>
    %c0_1 = arith.constant 0 : index
    %c0_2 = arith.constant 0 : index
    %1 = vector.load %arg2[%c0_1, %c0_2] : memref<128x128xbf16, #tpu.memory_space<vmem>>, vector<128x128xbf16>
    %cst = arith.constant dense<0.000000e+00> : vector<64x128xf32>
    %2 = tpu.matmul %0, %1, %cst {dimension_numbers = #tpu.dot_dimension_numbers<[1], [0], [0], [1], [0, 0, 1, 1], [], []>} : vector<64x128xbf16>, vector<128x128xbf16>, vector<64x128xf32> -> vector<64x128xf32>
    %c0_3 = arith.constant 0 : index
    %c0_4 = arith.constant 0 : index
    %3 = vector.load %arg3[%c0_3, %c0_4] : memref<1x128xf32, #tpu.memory_space<vmem>>, vector<1x128xf32>
    %4 = vector.broadcast %3 : vector<1x128xf32> to vector<64x128xf32>
    %5 = arith.addf %2, %4 : vector<64x128xf32>
    %6 = arith.truncf %5 : vector<64x128xf32> to vector<64x128xbf16>
    %c0_5 = arith.constant 0 : index
    %c0_6 = arith.constant 0 : index
    %7 = vector.load %arg4[%c0_5, %c0_6] : memref<64x128xbf16, #tpu.memory_space<vmem>>, vector<64x128xbf16>
    tpu.vector_store %arg4[%c0_5, %c0_6], %6 {strides = array<i32>} : memref<64x128xbf16, #tpu.memory_space<vmem>>, vector<64x128xbf16>,
    return
  }
  func.func @transform_0(%arg0: i32) -> (i32, i32) {
    %c0_i32 = arith.constant 0 : i32
    %c0_i32_0 = arith.constant 0 : i32
    return %arg0, %c0_i32 : i32, i32
  }
  func.func @transform_1(%arg0: i32) -> (i32, i32) {
    %c0_i32 = arith.constant 0 : i32
    %c0_i32_0 = arith.constant 0 : i32
    %c0_i32_1 = arith.constant 0 : i32
    return %c0_i32, %c0_i32_0 : i32, i32
  }
  func.func @transform_2(%arg0: i32) -> (i32, i32) {
    %c0_i32 = arith.constant 0 : i32
    %c0_i32_0 = arith.constant 0 : i32
    %c0_i32_1 = arith.constant 0 : i32
    return %c0_i32, %c0_i32_0 : i32, i32
  }
  func.func @transform_3(%arg0: i32) -> (i32, i32) {
    %c0_i32 = arith.constant 0 : i32
    %c0_i32_0 = arith.constant 0 : i32
    return %arg0, %c0_i32 : i32, i32
  }
}

module attributes {stable_mosaic.version = 11 : i64} {
  func.func @_patch_embed_kernel(%arg0: i32, %arg1: memref<64x128xbf16, #tpu.memory_space<vmem>>, %arg2: memref<128x128xbf16, #tpu.memory_space<vmem>>, %arg3: memref<1x128xf32, #tpu.memory_space<vmem>>, %arg4: memref<64x128xbf16, #tpu.memory_space<vmem>>) attributes {dimension_semantics = [#tpu.dimension_semantics<parallel>], iteration_bounds = array<i64: 1>, scalar_prefetch = 0 : i64, scratch_operands = 0 : i64, tpu.core_type = #tpu.core_type<tc>, window_params = [{transform_indices = @transform_0, window_bounds = array<i64: 64, 128>}, {pipeline_mode = #tpu.pipeline_mode<synchronous>, transform_indices = @transform_1, window_bounds = array<i64: 128, 128>}, {pipeline_mode = #tpu.pipeline_mode<synchronous>, transform_indices = @transform_2, window_bounds = array<i64: 1, 128>}, {transform_indices = @transform_3, window_bounds = array<i64: 64, 128>}]} {
    %c0 = arith.constant 0 : index
    %c0_0 = arith.constant 0 : index
    %0 = vector.load %arg1[%c0, %c0_0] : memref<64x128xbf16, #tpu.memory_space<vmem>>, vector<64x128xbf16>
    %c0_1 = arith.constant 0 : index
    %c0_2 = arith.constant 0 : index
    %1 = vector.load %arg2[%c0_1, %c0_2] : memref<128x128xbf16, #tpu.memory_space<vmem>>, vector<128x128xbf16>
    %cst = arith.constant dense<0.000000e+00> : vector<64x128xf32>
    %2 = tpu.matmul %0, %1, %cst {dimension_numbers = #tpu.dot_dimension_numbers<[1], [0], [0], [1], [0, 0, 1, 1], [], []>} : vector<64x128xbf16>, vector<128x128xbf16>, vector<64x128xf32> -> vector<64x128xf32>
    %c0_3 = arith.constant 0 : index
    %c0_4 = arith.constant 0 : index
    %3 = vector.load %arg3[%c0_3, %c0_4] : memref<1x128xf32, #tpu.memory_space<vmem>>, vector<1x128xf32>
    %4 = vector.broadcast %3 : vector<1x128xf32> to vector<64x128xf32>
    %5 = arith.addf %2, %4 : vector<64x128xf32>
    %6 = arith.truncf %5 : vector<64x128xf32> to vector<64x128xbf16>
    %c0_5 = arith.constant 0 : index
    %c0_6 = arith.constant 0 : index
    %7 = vector.load %arg4[%c0_5, %c0_6] : memref<64x128xbf16, #tpu.memory_space<vmem>>, vector<64x128xbf16>
    tpu.vector_store %arg4[%c0_5, %c0_6], %6 {strides = array<i32>} : memref<64x128xbf16, #tpu.memory_space<vmem>>, vector<64x128xbf16>,
    return
  }
  func.func @transform_0(%arg0: i32) -> (i32, i32) {
    %c0_i32 = arith.constant 0 : i32
    %c0_i32_0 = arith.constant 0 : i32
    return %arg0, %c0_i32 : i32, i32
  }
  func.func @transform_1(%arg0: i32) -> (i32, i32) {
    %c0_i32 = arith.constant 0 : i32
    %c0_i32_0 = arith.constant 0 : i32
    %c0_i32_1 = arith.constant 0 : i32
    return %c0_i32, %c0_i32_0 : i32, i32
  }
  func.func @transform_2(%arg0: i32) -> (i32, i32) {
    %c0_i32 = arith.constant 0 : i32
    %c0_i32_0 = arith.constant 0 : i32
    %c0_i32_1 = arith.constant 0 : i32
    return %c0_i32, %c0_i32_0 : i32, i32
  }
  func.func @transform_3(%arg0: i32) -> (i32, i32) {
    %c0_i32 = arith.constant 0 : i32
    %c0_i32_0 = arith.constant 0 : i32
    return %arg0, %c0_i32 : i32, i32
  }
}

</mosaic_0001>

<bundles_post_ra>
// kernel: vjepa2_patch_embeddings_3d.1
= control target key start
LH: loop header
LB: loop body
LE: loop exit
PB: predicated region body
PF: predicated region fallthrough
CT: control target
= control target key end

     0   :  { %s380_s0 = inlined_call_operand.vmem [shape: bf16[64,128], index: 0, kind: input, shape index: {}]   ;;  %s381_s1 = inlined_call_operand.vmem [shape: bf16[128,128], index: 1, kind: input, shape index: {}]   ;;  %s382_s2 = inlined_call_operand.vmem [shape: f32[1,128], index: 2, kind: input, shape index: {}]   ;;  %s383_s3 = inlined_call_operand.hbm [shape: bf16[64,128], index: 3, kind: output, shape index: {}]  }
   0x1   :  { %v237_v0 = vld [vmem:[%s381_s1 + $0x38] sm:$0xff]  ;;  %v236_v1 = vld [vmem:[%s381_s1 + $0x30] sm:$0xff] }
   0x2   :  { %115 = vmatpush.bf16.msra.mxu0 %v237_v0  ;;  %261 = vmatpush.bf16.msra.mxu1 %v237_v0 }
   0x3   :  { %262 = vmatpush.bf16.msra.mxu2 %v237_v0  ;;  %263 = vmatpush.bf16.msra.mxu3 %v237_v0 }
   0x4   :  { %8 = vsyncpa [#allocation3], 0  ;;  %v235_v2 = vld [vmem:[%s381_s1 + $0x28] sm:$0xff]  ;;  %v234_v3 = vld [vmem:[%s381_s1 + $0x20] sm:$0xff]  ;;  %s316_s13 = smov 64   ;;  %s317_s14 = smov 4  }
   0x5   :  { %v233_v4 = vld [vmem:[%s381_s1 + $0x18] sm:$0xff]  ;;  %v232_v5 = vld [vmem:[%s381_s1 + $0x10] sm:$0xff]  ;;  %v231_v6 = vld [vmem:[%s381_s1 + $0x8] sm:$0xff] }
   0x6   :  { %116 = vmatpush.bf16.msra.mxu0 %v236_v1  ;;  %264 = vmatpush.bf16.msra.mxu1 %v236_v1  ;;  %v230_v7 = vld [vmem:[%s381_s1] sm:$0xff]  ;;  %v227_v9 = vld [vmem:[%s380_s0 + $0x8] sm:$0xff]  ;;  %v228_v10 = vld [vmem:[%s380_s0 + $0x10] sm:$0xff] }
   0x7   :  { %265 = vmatpush.bf16.msra.mxu2 %v236_v1  ;;  %266 = vmatpush.bf16.msra.mxu3 %v236_v1  ;;  %v226_v8 = vld [vmem:[%s380_s0] sm:$0xff]  ;;  %v229_v11 = vld [vmem:[%s380_s0 + $0x18] sm:$0xff]  ;;  %s315_s0 = smov [#allocation2]  }
   0x8   :  { %v288_v14 = vld [vmem:[%s382_s2] ss:$0 sm:$0xff]  ;;  %s164_s10 = sshll.u32 %s315_s0, 4  ;;  %s166_s2 = sshll.u32 %s383_s3, 4  ;;  %s165_s10 = int_to_ptr.vmem [resolvable:$true] %s164_s10  ;;  %s167_s2 = int_to_ptr.hbm [resolvable:$true] %s166_s2 }
   0xa   :  { %117 = vmatpush.bf16.msra.mxu0 %v235_v2  ;;  %267 = vmatpush.bf16.msra.mxu1 %v235_v2 }
   0xb   :  { %268 = vmatpush.bf16.msra.mxu2 %v235_v2  ;;  %269 = vmatpush.bf16.msra.mxu3 %v235_v2 }
   0xe   :  { %118 = vmatpush.bf16.msra.mxu0 %v234_v3  ;;  %270 = vmatpush.bf16.msra.mxu1 %v234_v3 }
   0xf   :  { %271 = vmatpush.bf16.msra.mxu2 %v234_v3  ;;  %272 = vmatpush.bf16.msra.mxu3 %v234_v3 }
  0x12   :  { %119 = vmatpush.bf16.msra.mxu0 %v233_v4  ;;  %273 = vmatpush.bf16.msra.mxu1 %v233_v4 }
  0x13   :  { %274 = vmatpush.bf16.msra.mxu2 %v233_v4  ;;  %275 = vmatpush.bf16.msra.mxu3 %v233_v4 }
  0x16   :  { %120 = vmatpush.bf16.msra.mxu0 %v232_v5  ;;  %276 = vmatpush.bf16.msra.mxu1 %v232_v5 }
  0x17   :  { %277 = vmatpush.bf16.msra.mxu2 %v232_v5  ;;  %278 = vmatpush.bf16.msra.mxu3 %v232_v5 }
  0x1a   :  { %121 = vmatpush.bf16.msra.mxu0 %v231_v6  ;;  %279 = vmatpush.bf16.msra.mxu1 %v231_v6 }
  0x1b   :  { %280 = vmatpush.bf16.msra.mxu2 %v231_v6  ;;  %281 = vmatpush.bf16.msra.mxu3 %v231_v6 }
  0x1e   :  { %122 = vmatpush.bf16.msra.mxu0 %v230_v7  ;;  %282 = vmatpush.bf16.msra.mxu1 %v230_v7 }
  0x1f   :  { %283 = vmatpush.bf16.msra.mxu2 %v230_v7  ;;  %284 = vmatpush.bf16.msra.mxu3 %v230_v7 }
  0x21   :  { %123 = vmatmul.bf16.vlgmr.msra.gmra.mxu0 %v226_v8  ;;  %128 = vmatmul.bf16.vlgmr.msra.gmra.mxu1 %v227_v9 }
  0x22   :  { %133 = vmatmul.bf16.vlgmr.msra.gmra.mxu2 %v228_v10  ;;  %138 = vmatmul.bf16.vlgmr.msra.gmra.mxu3 %v229_v11 }
  0x9e   :  { %v124_v12 = vpop.f32.mrf.mxu0  ;;  %v129_v13 = vpop.f32.mrf.mxu1 }
  0x9f   :  { %v125_v19 = vadd.f32 %v288_v14, %v124_v12  ;;  %v130_v20 = vadd.f32 %v288_v14, %v129_v13 }
  0xa5   :  { %v134_v15 = vpop.f32.mrf.mxu2  ;;  %v139_v16 = vpop.f32.mrf.mxu3 }
  0xa6   :  { %v126_v17 = vpop.f32.mrf.mxu0  ;;  %v131_v18 = vpop.f32.mrf.mxu1  ;;  %v135_v27 = vadd.f32 %v288_v14, %v134_v15  ;;  %v140_v28 = vadd.f32 %v288_v14, %v139_v16 }
  0xa7   :  { %v127_v21 = vadd.f32 %v288_v14, %v126_v17  ;;  %v132_v22 = vadd.f32 %v288_v14, %v131_v18 }
  0xa9   :  { %v241_v23 = vpack.c.bf16 %v127_v21, %v125_v19  ;;  %v246_v24 = vpack.c.bf16 %v132_v22, %v130_v20 }
  0xab   :  { %242 = vst [vmem:[#allocation2] sm:$0xff] %v241_v23  }
  0xac   :  { %258 = vst [vmem:[#allocation2 + $0x8] sm:$0xff] %v246_v24  }
  0xad   :  { %v136_v25 = vpop.f32.mrf.mxu2  ;;  %v141_v26 = vpop.f32.mrf.mxu3 }
  0xae   :  { %v137_v29 = vadd.f32 %v288_v14, %v136_v25  ;;  %v142_v30 = vadd.f32 %v288_v14, %v141_v26 }
  0xb0   :  { %v251_v31 = vpack.c.bf16 %v137_v29, %v135_v27  ;;  %v256_v32 = vpack.c.bf16 %v142_v30, %v140_v28 }
  0xb2   :  { %259 = vst [vmem:[#allocation2 + $0x10] sm:$0xff] %v251_v31  }
  0xb3   :  { %260 = vst [vmem:[#allocation2 + $0x18] sm:$0xff] %v256_v32  }
  0xb4   :  { %172 = dma.vmem_to_hbm [thread:$0]  %s165_s10, 512, %s167_s2, [#allocation3], %s316_s13, %s316_s13, %s317_s14  }
  0xb5   :  { %313 = dma.done.wait [#allocation3], 512  }
  0xb6   :  { %314 = vsyncadd [#allocation3], 4294966784 }
  0xb7   :  { %177 = vsyncpa [#allocation3], 1 }

// kernel: vjepa2_patch_embeddings_3d.1
= control target key start
LH: loop header
LB: loop body
LE: loop exit
PB: predicated region body
PF: predicated region fallthrough
CT: control target
= control target key end

     0   :  { %s380_s0 = inlined_call_operand.vmem [shape: bf16[64,128], index: 0, kind: input, shape index: {}]   ;;  %s381_s1 = inlined_call_operand.vmem [shape: bf16[128,128], index: 1, kind: input, shape index: {}]   ;;  %s382_s2 = inlined_call_operand.vmem [shape: f32[1,128], index: 2, kind: input, shape index: {}]   ;;  %s383_s3 = inlined_call_operand.hbm [shape: bf16[64,128], index: 3, kind: output, shape index: {}]  }
   0x1   :  { %v237_v0 = vld [vmem:[%s381_s1 + $0x38] sm:$0xff]  ;;  %v236_v1 = vld [vmem:[%s381_s1 + $0x30] sm:$0xff] }
   0x2   :  { %115 = vmatpush.bf16.msra.mxu0 %v237_v0  ;;  %261 = vmatpush.bf16.msra.mxu1 %v237_v0 }
   0x3   :  { %262 = vmatpush.bf16.msra.mxu2 %v237_v0  ;;  %263 = vmatpush.bf16.msra.mxu3 %v237_v0 }
   0x4   :  { %8 = vsyncpa [#allocation3], 0  ;;  %v235_v2 = vld [vmem:[%s381_s1 + $0x28] sm:$0xff]  ;;  %v234_v3 = vld [vmem:[%s381_s1 + $0x20] sm:$0xff]  ;;  %s316_s13 = smov 64   ;;  %s317_s14 = smov 4  }
   0x5   :  { %v233_v4 = vld [vmem:[%s381_s1 + $0x18] sm:$0xff]  ;;  %v232_v5 = vld [vmem:[%s381_s1 + $0x10] sm:$0xff]  ;;  %v231_v6 = vld [vmem:[%s381_s1 + $0x8] sm:$0xff] }
   0x6   :  { %116 = vmatpush.bf16.msra.mxu0 %v236_v1  ;;  %264 = vmatpush.bf16.msra.mxu1 %v236_v1  ;;  %v230_v7 = vld [vmem:[%s381_s1] sm:$0xff]  ;;  %v227_v9 = vld [vmem:[%s380_s0 + $0x8] sm:$0xff]  ;;  %v228_v10 = vld [vmem:[%s380_s0 + $0x10] sm:$0xff] }
   0x7   :  { %265 = vmatpush.bf16.msra.mxu2 %v236_v1  ;;  %266 = vmatpush.bf16.msra.mxu3 %v236_v1  ;;  %v226_v8 = vld [vmem:[%s380_s0] sm:$0xff]  ;;  %v229_v11 = vld [vmem:[%s380_s0 + $0x18] sm:$0xff]  ;;  %s315_s0 = smov [#allocation2]  }
   0x8   :  { %v288_v14 = vld [vmem:[%s382_s2] ss:$0 sm:$0xff]  ;;  %s164_s10 = sshll.u32 %s315_s0, 4  ;;  %s166_s2 = sshll.u32 %s383_s3, 4  ;;  %s165_s10 = int_to_ptr.vmem [resolvable:$true] %s164_s10  ;;  %s167_s2 = int_to_ptr.hbm [resolvable:$true] %s166_s2 }
   0xa   :  { %117 = vmatpush.bf16.msra.mxu0 %v235_v2  ;;  %267 = vmatpush.bf16.msra.mxu1 %v235_v2 }
   0xb   :  { %268 = vmatpush.bf16.msra.mxu2 %v235_v2  ;;  %269 = vmatpush.bf16.msra.mxu3 %v235_v2 }
   0xe   :  { %118 = vmatpush.bf16.msra.mxu0 %v234_v3  ;;  %270 = vmatpush.bf16.msra.mxu1 %v234_v3 }
   0xf   :  { %271 = vmatpush.bf16.msra.mxu2 %v234_v3  ;;  %272 = vmatpush.bf16.msra.mxu3 %v234_v3 }
  0x12   :  { %119 = vmatpush.bf16.msra.mxu0 %v233_v4  ;;  %273 = vmatpush.bf16.msra.mxu1 %v233_v4 }
  0x13   :  { %274 = vmatpush.bf16.msra.mxu2 %v233_v4  ;;  %275 = vmatpush.bf16.msra.mxu3 %v233_v4 }
  0x16   :  { %120 = vmatpush.bf16.msra.mxu0 %v232_v5  ;;  %276 = vmatpush.bf16.msra.mxu1 %v232_v5 }
  0x17   :  { %277 = vmatpush.bf16.msra.mxu2 %v232_v5  ;;  %278 = vmatpush.bf16.msra.mxu3 %v232_v5 }
  0x1a   :  { %121 = vmatpush.bf16.msra.mxu0 %v231_v6  ;;  %279 = vmatpush.bf16.msra.mxu1 %v231_v6 }
  0x1b   :  { %280 = vmatpush.bf16.msra.mxu2 %v231_v6  ;;  %281 = vmatpush.bf16.msra.mxu3 %v231_v6 }
  0x1e   :  { %122 = vmatpush.bf16.msra.mxu0 %v230_v7  ;;  %282 = vmatpush.bf16.msra.mxu1 %v230_v7 }
  0x1f   :  { %283 = vmatpush.bf16.msra.mxu2 %v230_v7  ;;  %284 = vmatpush.bf16.msra.mxu3 %v230_v7 }
  0x21   :  { %123 = vmatmul.bf16.vlgmr.msra.gmra.mxu0 %v226_v8  ;;  %128 = vmatmul.bf16.vlgmr.msra.gmra.mxu1 %v227_v9 }
  0x22   :  { %133 = vmatmul.bf16.vlgmr.msra.gmra.mxu2 %v228_v10  ;;  %138 = vmatmul.bf16.vlgmr.msra.gmra.mxu3 %v229_v11 }
  0x9e   :  { %v124_v12 = vpop.f32.mrf.mxu0  ;;  %v129_v13 = vpop.f32.mrf.mxu1 }
  0x9f   :  { %v125_v19 = vadd.f32 %v288_v14, %v124_v12  ;;  %v130_v20 = vadd.f32 %v288_v14, %v129_v13 }
  0xa5   :  { %v134_v15 = vpop.f32.mrf.mxu2  ;;  %v139_v16 = vpop.f32.mrf.mxu3 }
  0xa6   :  { %v126_v17 = vpop.f32.mrf.mxu0  ;;  %v131_v18 = vpop.f32.mrf.mxu1  ;;  %v135_v27 = vadd.f32 %v288_v14, %v134_v15  ;;  %v140_v28 = vadd.f32 %v288_v14, %v139_v16 }
  0xa7   :  { %v127_v21 = vadd.f32 %v288_v14, %v126_v17  ;;  %v132_v22 = vadd.f32 %v288_v14, %v131_v18 }
  0xa9   :  { %v241_v23 = vpack.c.bf16 %v127_v21, %v125_v19  ;;  %v246_v24 = vpack.c.bf16 %v132_v22, %v130_v20 }
  0xab   :  { %242 = vst [vmem:[#allocation2] sm:$0xff] %v241_v23  }
  0xac   :  { %258 = vst [vmem:[#allocation2 + $0x8] sm:$0xff] %v246_v24  }
  0xad   :  { %v136_v25 = vpop.f32.mrf.mxu2  ;;  %v141_v26 = vpop.f32.mrf.mxu3 }
  0xae   :  { %v137_v29 = vadd.f32 %v288_v14, %v136_v25  ;;  %v142_v30 = vadd.f32 %v288_v14, %v141_v26 }
  0xb0   :  { %v251_v31 = vpack.c.bf16 %v137_v29, %v135_v27  ;;  %v256_v32 = vpack.c.bf16 %v142_v30, %v140_v28 }
  0xb2   :  { %259 = vst [vmem:[#allocation2 + $0x10] sm:$0xff] %v251_v31  }
  0xb3   :  { %260 = vst [vmem:[#allocation2 + $0x18] sm:$0xff] %v256_v32  }
  0xb4   :  { %172 = dma.vmem_to_hbm [thread:$0]  %s165_s10, 512, %s167_s2, [#allocation3], %s316_s13, %s316_s13, %s317_s14  }
  0xb5   :  { %313 = dma.done.wait [#allocation3], 512  }
  0xb6   :  { %314 = vsyncadd [#allocation3], 4294966784 }
  0xb7   :  { %177 = vsyncpa [#allocation3], 1 }

</bundles_post_ra>
